<compile_context>
chip_gen: v7x
topology: tpu7x:2x2x1
jax: 0.10.0
libtpu: 0.0.40
codegen_flags: <defaults>
</compile_context>

<pallas_src>
import functools

import jax
import jax.numpy as jnp
from jax.experimental import pallas as pl
from jax.experimental.pallas import tpu as pltpu

_LANE = 128
_SUBLANE = 8


def _round_up(n, m):
    return ((n + m - 1) // m) * m


def _net_kernel(x_ref, w1_ref, b1_ref, w2_ref, b2_ref, o_ref):
    n_out = o_ref.shape[1]

    # hidden = sigmoid(x @ W1 + b1): cast x to bf16 in-kernel (free under the MXU),
    # f32 accumulation on the MXU.
    x = x_ref[...].astype(w1_ref.dtype)
    h = jnp.dot(x, w1_ref[...], preferred_element_type=jnp.float32)
    h = h + b1_ref[...]
    # sigmoid via tanh (EUP slot, full accuracy) instead of a VALU f32 divide.
    h = 0.5 * jnp.tanh(0.5 * h) + 0.5

    # logits = h @ W2 + b2 (h cast to bf16 for the MXU, accumulate f32).
    logits = jnp.dot(h.astype(w2_ref.dtype), w2_ref[...],
                     preferred_element_type=jnp.float32)
    logits = logits + b2_ref[...]

    # Numerically stable log_softmax over the lane (class) axis. Padded classes carry a
    # -1e30 bias, so exp underflows to exactly 0 and the real-class result is exact.
    m = jnp.max(logits, axis=1, keepdims=True)
    s = logits - m
    lse = jnp.log(jnp.sum(jnp.exp(s), axis=1, keepdims=True))

    # Narrow store: only the real n_out classes are written back to HBM.
    o_ref[...] = (s - lse)[:, :n_out].astype(o_ref.dtype)


def prepare_params(w1, b1, w2, b2):
    """One-time padding/casting of the weights (do this at param init / model load,
    NOT per forward call). Hidden and output feature axes are zero-padded to multiples
    of 128 lanes; padded output classes get a -1e30 bias so they vanish in the softmax."""
    n_feature, n_hidden = w1.shape
    n_out = w2.shape[1]
    hp = _round_up(n_hidden, _LANE)
    op = _round_up(n_out, _LANE)

    w1p = jnp.zeros((n_feature, hp), jnp.bfloat16).at[:, :n_hidden].set(
        w1.astype(jnp.bfloat16))
    b1p = jnp.zeros((1, hp), jnp.float32).at[:, :n_hidden].set(b1.astype(jnp.float32))
    w2p = jnp.zeros((hp, op), jnp.bfloat16).at[:n_hidden, :n_out].set(
        w2.astype(jnp.bfloat16))
    b2p = jnp.full((1, op), -1e30, jnp.float32).at[:, :n_out].set(b2.astype(jnp.float32))
    return w1p, b1p, w2p, b2p


@functools.partial(jax.jit, static_argnames=("n_out", "block_b"))
def net_forward(x, w1p, b1p, w2p, b2p, *, n_out, block_b=1024):
    """x: [B, n_feature] f32; pre-padded params from prepare_params().
    Returns [B, n_out] f32 log-probs."""
    B, n_feature = x.shape
    hp = w1p.shape[1]
    op = w2p.shape[1]

    # Batch tile: multiple of 8 sublanes; sized so that B >= 2*tb whenever possible so
    # dimension_semantics=("parallel",) can shard the grid across v7x's two TensorCores
    # (no-op on v5e/v6e). No explicit batch padding: Pallas handles the ragged last block
    # (garbage input rows only feed output rows that are discarded on writeback).
    half = _round_up(pl.cdiv(B, 2), _SUBLANE)
    tb = max(_SUBLANE, min(block_b, half))
    grid = (pl.cdiv(B, tb),)

    cost = pl.CostEstimate(
        flops=2 * B * (n_feature * hp + hp * op),
        transcendentals=B * (hp + op),                      # tanh + exp
        bytes_accessed=(4 * B * n_feature                   # x read (f32)
                        + 2 * (n_feature * hp + hp * op)    # bf16 weights
                        + 4 * (hp + op)                     # f32 biases
                        + 4 * B * n_out),                   # narrow f32 output
    )

    out = pl.pallas_call(
        _net_kernel,
        out_shape=jax.ShapeDtypeStruct((B, n_out), jnp.float32),
        grid=grid,
        in_specs=[
            pl.BlockSpec((tb, n_feature), lambda i: (i, 0)),   # x tile (f32), pipelined
            pl.BlockSpec((n_feature, hp), lambda i: (0, 0)),   # W1: VMEM-resident
            pl.BlockSpec((1, hp), lambda i: (0, 0)),           # b1: VMEM-resident
            pl.BlockSpec((hp, op), lambda i: (0, 0)),          # W2: VMEM-resident
            pl.BlockSpec((1, op), lambda i: (0, 0)),           # b2: VMEM-resident
        ],
        out_specs=pl.BlockSpec((tb, n_out), lambda i: (i, 0)),  # narrow output tile
        compiler_params=pltpu.CompilerParams(
            dimension_semantics=("parallel",),
            vmem_limit_bytes=32 * 1024 * 1024,
        ),
        cost_estimate=cost,
    )(x, w1p, b1p, w2p, b2p)

    return out


def init_params(key, n_feature, n_hidden, n_out):
    """Deterministic init mimicking torch.nn.Linear default (uniform +-1/sqrt(fan_in)).
    Weights are stored already transposed to [in, out]."""
    k1, k2, k3, k4 = jax.random.split(key, 4)
    lim1 = 1.0 / jnp.sqrt(jnp.float32(n_feature))
    lim2 = 1.0 / jnp.sqrt(jnp.float32(n_hidden))
    w1 = jax.random.uniform(k1, (n_feature, n_hidden), jnp.float32, -lim1, lim1)
    b1 = jax.random.uniform(k2, (1, n_hidden), jnp.float32, -lim1, lim1)
    w2 = jax.random.uniform(k3, (n_hidden, n_out), jnp.float32, -lim2, lim2)
    b2 = jax.random.uniform(k4, (1, n_out), jnp.float32, -lim2, lim2)
    return w1, b1, w2, b2


if __name__ == "__main__":
    key = jax.random.PRNGKey(0)
    k_x, k_p = jax.random.split(key)

    # Small, module-consistent toy shapes (production perf should be measured at B>=1024).
    B, n_feature, n_hidden, n_out = 8, 32, 32, 16
    x = jax.random.normal(k_x, (B, n_feature), jnp.float32)
    w1, b1, w2, b2 = init_params(k_p, n_feature, n_hidden, n_out)

    # One-time weight padding/casting (hoisted out of the forward path).
    w1p, b1p, w2p, b2p = prepare_params(w1, b1, w2, b2)
    w1p, b1p, w2p, b2p = jax.block_until_ready((w1p, b1p, w2p, b2p))

    out = net_forward(x, w1p, b1p, w2p, b2p, n_out=n_out)
    out = jax.block_until_ready(out)
    assert out.shape == (B, n_out)

    # Matched-precision reference (same bf16 casts on the matmul inputs, f32 elsewhere).
    xb, w1b, w2b = (a.astype(jnp.bfloat16) for a in (x, w1, w2))
    h_ref = jax.nn.sigmoid(jnp.dot(xb, w1b, preferred_element_type=jnp.float32) + b1)
    logits_ref = jnp.dot(h_ref.astype(jnp.bfloat16), w2b,
                         preferred_element_type=jnp.float32) + b2
    ref = jax.nn.log_softmax(logits_ref, axis=1)
    assert jnp.max(jnp.abs(out - ref)) < 5e-3

    # Loose sanity check against the pure-f32 forward (bf16 matmul quantization only).
    h_f32 = jax.nn.sigmoid(x @ w1 + b1)
    ref_f32 = jax.nn.log_softmax(h_f32 @ w2 + b2, axis=1)
    assert jnp.max(jnp.abs(out - ref_f32)) < 1e-1

    print("KERNEL_OK")
</pallas_src>

<mosaic_0001>
module attributes {stable_mosaic.version = 11 : i64} {
  func.func @_net_kernel(%arg0: i32, %arg1: memref<8x32xf32, #tpu.memory_space<vmem>>, %arg2: memref<32x128xbf16, #tpu.memory_space<vmem>>, %arg3: memref<1x128xf32, #tpu.memory_space<vmem>>, %arg4: memref<128x128xbf16, #tpu.memory_space<vmem>>, %arg5: memref<1x128xf32, #tpu.memory_space<vmem>>, %arg6: memref<8x16xf32, #tpu.memory_space<vmem>>) attributes {dimension_semantics = [#tpu.dimension_semantics<parallel>], iteration_bounds = array<i64: 1>, scalar_prefetch = 0 : i64, scratch_operands = 0 : i64, tpu.core_type = #tpu.core_type<tc>, window_params = [{transform_indices = @transform_0, window_bounds = array<i64: 8, 32>}, {pipeline_mode = #tpu.pipeline_mode<synchronous>, transform_indices = @transform_1, window_bounds = array<i64: 32, 128>}, {pipeline_mode = #tpu.pipeline_mode<synchronous>, transform_indices = @transform_2, window_bounds = array<i64: 1, 128>}, {pipeline_mode = #tpu.pipeline_mode<synchronous>, transform_indices = @transform_3, window_bounds = array<i64: 128, 128>}, {pipeline_mode = #tpu.pipeline_mode<synchronous>, transform_indices = @transform_4, window_bounds = array<i64: 1, 128>}, {transform_indices = @transform_5, window_bounds = array<i64: 8, 16>}]} {
    %c0 = arith.constant 0 : index
    %c0_0 = arith.constant 0 : index
    %0 = vector.load %arg1[%c0, %c0_0] : memref<8x32xf32, #tpu.memory_space<vmem>>, vector<8x32xf32>
    %1 = arith.truncf %0 : vector<8x32xf32> to vector<8x32xbf16>
    %c0_1 = arith.constant 0 : index
    %c0_2 = arith.constant 0 : index
    %2 = vector.load %arg2[%c0_1, %c0_2] : memref<32x128xbf16, #tpu.memory_space<vmem>>, vector<32x128xbf16>
    %cst = arith.constant dense<0.000000e+00> : vector<8x128xf32>
    %3 = tpu.matmul %1, %2, %cst {dimension_numbers = #tpu.dot_dimension_numbers<[1], [0], [0], [1], [0, 0, 1, 1], [], []>} : vector<8x32xbf16>, vector<32x128xbf16>, vector<8x128xf32> -> vector<8x128xf32>
    %c0_3 = arith.constant 0 : index
    %c0_4 = arith.constant 0 : index
    %4 = vector.load %arg3[%c0_3, %c0_4] : memref<1x128xf32, #tpu.memory_space<vmem>>, vector<1x128xf32>
    %5 = vector.broadcast %4 : vector<1x128xf32> to vector<8x128xf32>
    %6 = arith.addf %3, %5 : vector<8x128xf32>
    %cst_5 = arith.constant 5.000000e-01 : f32
    %7 = vector.broadcast %cst_5 : f32 to vector<8x128xf32>
    %8 = arith.mulf %7, %6 : vector<8x128xf32>
    %9 = math.tanh %8 : vector<8x128xf32>
    %cst_6 = arith.constant 5.000000e-01 : f32
    %10 = vector.broadcast %cst_6 : f32 to vector<8x128xf32>
    %11 = arith.mulf %10, %9 : vector<8x128xf32>
    %cst_7 = arith.constant 5.000000e-01 : f32
    %12 = vector.broadcast %cst_7 : f32 to vector<8x128xf32>
    %13 = arith.addf %11, %12 : vector<8x128xf32>
    %14 = arith.truncf %13 : vector<8x128xf32> to vector<8x128xbf16>
    %c0_8 = arith.constant 0 : index
    %c0_9 = arith.constant 0 : index
    %15 = vector.load %arg4[%c0_8, %c0_9] : memref<128x128xbf16, #tpu.memory_space<vmem>>, vector<128x128xbf16>
    %cst_10 = arith.constant dense<0.000000e+00> : vector<8x128xf32>
    %16 = tpu.matmul %14, %15, %cst_10 {dimension_numbers = #tpu.dot_dimension_numbers<[1], [0], [0], [1], [0, 0, 1, 1], [], []>} : vector<8x128xbf16>, vector<128x128xbf16>, vector<8x128xf32> -> vector<8x128xf32>
    %c0_11 = arith.constant 0 : index
    %c0_12 = arith.constant 0 : index
    %17 = vector.load %arg5[%c0_11, %c0_12] : memref<1x128xf32, #tpu.memory_space<vmem>>, vector<1x128xf32>
    %18 = vector.broadcast %17 : vector<1x128xf32> to vector<8x128xf32>
    %19 = arith.addf %16, %18 : vector<8x128xf32>
    %cst_13 = arith.constant dense<0xFF800000> : vector<8xf32>
    %20 = vector.multi_reduction <maximumf>, %19, %cst_13 [1] : vector<8x128xf32> to vector<8xf32>
    %21 = vector.shape_cast %20 : vector<8xf32> to vector<8x1xf32>
    %22 = vector.broadcast %21 : vector<8x1xf32> to vector<8x128xf32>
    %23 = arith.subf %19, %22 : vector<8x128xf32>
    %24 = math.exp %23 : vector<8x128xf32>
    %cst_14 = arith.constant dense<0.000000e+00> : vector<8xf32>
    %25 = vector.multi_reduction <add>, %24, %cst_14 [1] : vector<8x128xf32> to vector<8xf32>
    %26 = vector.shape_cast %25 : vector<8xf32> to vector<8x1xf32>
    %27 = math.log %26 : vector<8x1xf32>
    %28 = vector.broadcast %27 : vector<8x1xf32> to vector<8x128xf32>
    %29 = arith.subf %23, %28 : vector<8x128xf32>
    %30 = vector.extract_strided_slice %29 {offsets = [0, 0], sizes = [8, 16], strides = [1, 1]} : vector<8x128xf32> to vector<8x16xf32>
    %c0_15 = arith.constant 0 : index
    %c0_16 = arith.constant 0 : index
    %31 = vector.load %arg6[%c0_15, %c0_16] : memref<8x16xf32, #tpu.memory_space<vmem>>, vector<8x16xf32>
    tpu.vector_store %arg6[%c0_15, %c0_16], %30 {strides = array<i32>} : memref<8x16xf32, #tpu.memory_space<vmem>>, vector<8x16xf32>,
    return
  }
  func.func @transform_0(%arg0: i32) -> (i32, i32) {
    %c0_i32 = arith.constant 0 : i32
    %c0_i32_0 = arith.constant 0 : i32
    return %arg0, %c0_i32 : i32, i32
  }
  func.func @transform_1(%arg0: i32) -> (i32, i32) {
    %c0_i32 = arith.constant 0 : i32
    %c0_i32_0 = arith.constant 0 : i32
    %c0_i32_1 = arith.constant 0 : i32
    return %c0_i32, %c0_i32_0 : i32, i32
  }
  func.func @transform_2(%arg0: i32) -> (i32, i32) {
    %c0_i32 = arith.constant 0 : i32
    %c0_i32_0 = arith.constant 0 : i32
    %c0_i32_1 = arith.constant 0 : i32
    return %c0_i32, %c0_i32_0 : i32, i32
  }
  func.func @transform_3(%arg0: i32) -> (i32, i32) {
    %c0_i32 = arith.constant 0 : i32
    %c0_i32_0 = arith.constant 0 : i32
    %c0_i32_1 = arith.constant 0 : i32
    return %c0_i32, %c0_i32_0 : i32, i32
  }
  func.func @transform_4(%arg0: i32) -> (i32, i32) {
    %c0_i32 = arith.constant 0 : i32
    %c0_i32_0 = arith.constant 0 : i32
    %c0_i32_1 = arith.constant 0 : i32
    return %c0_i32, %c0_i32_0 : i32, i32
  }
  func.func @transform_5(%arg0: i32) -> (i32, i32) {
    %c0_i32 = arith.constant 0 : i32
    %c0_i32_0 = arith.constant 0 : i32
    return %arg0, %c0_i32 : i32, i32
  }
}

</mosaic_0001>

<bundles_post_ra>
// kernel: net_forward.1
= control target key start
LH: loop header
LB: loop body
LE: loop exit
PB: predicated region body
PF: predicated region fallthrough
CT: control target
= control target key end

     0   :  { %10 = vsyncpa [#allocation3], 0  ;;  %s543_s0 = inlined_call_operand.hbm [shape: f32[8,32], index: 0, kind: input, shape index: {}]   ;;  %s544_s1 = inlined_call_operand.hbm [shape: bf16[32,128], index: 1, kind: input, shape index: {}]   ;;  %s545_s2 = inlined_call_operand.vmem [shape: f32[1,128], index: 2, kind: input, shape index: {}]   ;;  %s546_s3 = inlined_call_operand.hbm [shape: bf16[128,128], index: 3, kind: input, shape index: {}]   ;;  %s547_s4 = inlined_call_operand.vmem [shape: f32[1,128], index: 4, kind: input, shape index: {}]   ;;  %s548_s5 = inlined_call_operand.hbm [shape: f32[8,16], index: 5, kind: output, shape index: {}]  }
   0x1   :  { %11 = vsyncpa [#allocation6], 0 }
   0x2   :  { %12 = vsyncpa [#allocation4], 0  ;;  %s445_s18 = smov [#allocation5]   ;;  %s351_s22 = scalar_lea.hbm %s544_s1, 256 }
   0x3   :  { %s28_s19 = sshll.u32 %s445_s18, 4  ;;  %p352_p0 = scmp.ne.s32.totalorder %s544_s1, %s351_s22  ;;  %s29_s19 = int_to_ptr.vmem [resolvable:$true] %s28_s19 }
   0x4   :  { %p355_p1 = scmp.lt.u32.totalorder %s351_s22, %s544_s1 }
   0x6   :  { %p357_p2 = pnand %p355_p1, %p352_p0 }
   0x8   :  { %360 = shalt.err (!%p357_p2)
}
   0x9   :  { %s361_s27 = scalar_lea.vmem %s29_s19, 256  ;;  %p366_p4 = scmp.lt.s32.totalorder %s29_s19, %s29_s19 }
   0xa   :  { %p362_p3 = scmp.ne.s32.totalorder %s29_s19, %s361_s27  ;;  %p367_p5 = scmp.lt.s32.totalorder %s361_s27, %s361_s27 }
   0xc   :  { %p368_p6 = por %p367_p5, %p366_p4 }
   0xe   :  { %p369_p7 = pnand %p368_p6, %p362_p3 }
  0x10   :  { %372 = shalt.err (!%p369_p7)
}
  0x11   :  { %s446_s28 = smov 64   ;;  %s447_s29 = smov 4  }
  0x12   :  { %34 = dma.hbm_to_vmem [thread:$0]  %s544_s1, 256, %s29_s19, [#allocation6], %s446_s28, %s446_s28, %s447_s29  }
  0x13   :  { %s448_s7 = smov [#allocation2]   ;;  %s449_s9 = smov [#allocation7]  }
  0x14   :  { %s19_s8 = sshll.u32 %s448_s7, 4  ;;  %s42_s10 = sshll.u32 %s449_s9, 4  ;;  %s20_s8 = int_to_ptr.vmem [resolvable:$true] %s19_s8  ;;  %s43_s10 = int_to_ptr.vmem [resolvable:$true] %s42_s10 }
  0x15   :  { %s373_s13 = scalar_lea.hbm %s543_s0, 128 }
  0x16   :  { %p374_p8 = scmp.ne.s32.totalorder %s543_s0, %s373_s13  ;;  %p377_p9 = scmp.lt.u32.totalorder %s373_s13, %s543_s0 }
  0x18   :  { %p379_p10 = pnand %p377_p9, %p374_p8 }
  0x1a   :  { %382 = shalt.err (!%p379_p10)
}
  0x1b   :  { %s383_s1 = scalar_lea.vmem %s20_s8, 128  ;;  %p388_p12 = scmp.lt.s32.totalorder %s20_s8, %s20_s8 }
  0x1c   :  { %p384_p11 = scmp.ne.s32.totalorder %s20_s8, %s383_s1  ;;  %p389_p13 = scmp.lt.s32.totalorder %s383_s1, %s383_s1 }
  0x1e   :  { %p390_p0 = por %p389_p13, %p388_p12 }
  0x20   :  { %p391_p1 = pnand %p390_p0, %p384_p11 }
  0x22   :  { %394 = shalt.err (!%p391_p1)
}
  0x23   :  { %22 = dma.hbm_to_vmem [thread:$0]  %s543_s0, 128, %s20_s8, [#allocation3]  }
  0x24   :  { %s395_s22 = scalar_lea.hbm %s546_s3, 1024 }
  0x25   :  { %p396_p2 = scmp.ne.s32.totalorder %s546_s3, %s395_s22  ;;  %p399_p3 = scmp.lt.u32.totalorder %s395_s22, %s546_s3 }
  0x27   :  { %p401_p4 = pnand %p399_p3, %p396_p2 }
  0x29   :  { %404 = shalt.err (!%p401_p4)
}
  0x2a   :  { %s405_s27 = scalar_lea.vmem %s43_s10, 1024  ;;  %p410_p6 = scmp.lt.s32.totalorder %s43_s10, %s43_s10 }
  0x2b   :  { %p406_p5 = scmp.ne.s32.totalorder %s43_s10, %s405_s27  ;;  %p411_p7 = scmp.lt.s32.totalorder %s405_s27, %s405_s27 }
  0x2d   :  { %p412_p8 = por %p411_p7, %p410_p6 }
  0x2f   :  { %p413_p9 = pnand %p412_p8, %p406_p5 }
  0x31   :  { %416 = shalt.err (!%p413_p9)
}
  0x32   :  { %48 = dma.hbm_to_vmem [thread:$0]  %s546_s3, 1024, %s43_s10, [#allocation6], %s446_s28, %s446_s28, %s447_s29  }
  0x33   :  { %439 = dma.done.wait [#allocation3], 128  }
  0x34   :  { %440 = vsyncadd [#allocation3], 4294967168 }
  0x35   :  { %441 = dma.done.wait [#allocation6], 1280  }
  0x36   :  { %442 = vsyncadd [#allocation6], 4294966016  ;;  %v450_v0 = vmov 0.0   ;;  %vm451_vm0 = vmmov 0   ;;  %v335_v1 = vld [vmem:[#allocation5] sm:$0xff]   ;;  %v336_v2 = vld [vmem:[#allocation5 + $0x8] sm:$0xff]  }
  0x37   :  { %299 = vmatprep.subr.bf16.mxu0 %v450_v0  ;;  %303 = vmatprep.mubr.msk.bf16.mxu0 %vm451_vm0, %v450_v0  ;;  %v61_v3 = vld [vmem:[#allocation2] sm:$0xff]  ;;  %v337_v4 = vld [vmem:[#allocation7] sm:$0xff]   ;;  %vm86_vm1 = vcmask 261120   ;;  %v339_v7 = vld [vmem:[#allocation7 + $0x10] sm:$0xff]   ;;  %vm256_vm2 = vcmask 130048  }
  0x38   :  { %307 = vmatprep.subr.bf16.mxu1 %v450_v0  ;;  %323 = vmatprep.mubr.msk.bf16.mxu1 %vm451_vm0, %v450_v0  ;;  %v62_v5 = vpack.c.bf16 %v61_v3, %v61_v3  ;;  %v338_v6 = vld [vmem:[#allocation7 + $0x8] sm:$0xff]   ;;  %v340_v8 = vld [vmem:[#allocation7 + $0x18] sm:$0xff]   ;;  %v341_v9 = vld [vmem:[#allocation7 + $0x20] sm:$0xff]  }
  0x39   :  { %300 = vmatpush3.bf16.msra.mxu0 %v335_v1  ;;  %308 = vmatpush3.bf16.msra.mxu1 %v337_v4  ;;  %v342_v10 = vld [vmem:[#allocation7 + $0x28] sm:$0xff]   ;;  %v343_v11 = vld [vmem:[#allocation7 + $0x30] sm:$0xff]   ;;  %v344_v12 = vld [vmem:[#allocation7 + $0x38] sm:$0xff]  }
  0x3a   :  { %301 = vmatprep.subr.bf16.mxu0 %v450_v0  ;;  %309 = vmatprep.subr.bf16.mxu1 %v450_v0  ;;  %v274_v13 = vld [vmem:[%s545_s2] ss:$0 sm:$0xff]  ;;  %s452_s2 = smov [#allocation8]  }
  0x3b   :  { %v278_v24 = vld [vmem:[%s547_s4] ss:$0 sm:$0xff]  ;;  %s264_s7 = sshll.u32 %s452_s2, 4  ;;  %s265_s7 = int_to_ptr.vmem [resolvable:$true] %s264_s7 }
  0x3c   :  { %s417_s4 = scalar_lea.vmem %s265_s7, 128  ;;  %p422_p11 = scmp.lt.s32.totalorder %s265_s7, %s265_s7 }
  0x3d   :  { %302 = vmatpush3.bf16.msra.mxu0 %v336_v2  ;;  %310 = vmatpush3.bf16.msra.mxu1 %v338_v6  ;;  %p418_p10 = scmp.ne.s32.totalorder %s265_s7, %s417_s4  ;;  %p423_p12 = scmp.lt.s32.totalorder %s417_s4, %s417_s4 }
  0x3e   :  { %311 = vmatprep.subr.bf16.mxu1 %v450_v0 }
  0x3f   :  { %p424_p13 = por %p423_p12, %p422_p11 }
  0x40   :  { %304 = vmatmul.mubr.msk.bf16.vlgmr.msra.gmra.mrb[0].mxu0 %vm86_vm1, %v62_v5 }
  0x41   :  { %312 = vmatpush3.bf16.msra.mxu1 %v339_v7  ;;  %p425_p0 = pnand %p424_p13, %p418_p10 }
  0x42   :  { %313 = vmatprep.subr.bf16.mxu1 %v450_v0 }
  0x45   :  { %314 = vmatpush3.bf16.msra.mxu1 %v340_v8 }
  0x46   :  { %315 = vmatprep.subr.bf16.mxu1 %v450_v0 }
  0x49   :  { %316 = vmatpush3.bf16.msra.mxu1 %v341_v9 }
  0x4a   :  { %317 = vmatprep.subr.bf16.mxu1 %v450_v0 }
  0x4d   :  { %318 = vmatpush3.bf16.msra.mxu1 %v342_v10 }
  0x4e   :  { %319 = vmatprep.subr.bf16.mxu1 %v450_v0 }
  0x51   :  { %320 = vmatpush3.bf16.msra.mxu1 %v343_v11 }
  0x52   :  { %321 = vmatprep.subr.bf16.mxu1 %v450_v0 }
  0x55   :  { %322 = vmatpush3.bf16.msra.mxu1 %v344_v12 }
 0x113   :  { %v124_v14 = vpop.f32.mrb[0].mxu0 }
 0x114   :  { %v125_v15 = vadd.f32 %v274_v13, %v124_v14  ;;  %v305_v16 = vpop.f32.mrb[1].mxu0 }
 0x115   :  { %v127_v17 = vpop.f32.mrb[2].mxu0 }
 0x116   :  { %v130_v18 = vmul.f32 0.5, %v125_v15  ;;  %v306_v19 = vpop.f32.mrb[3].mxu0 }
 0x118   :  { %345 = vtanh.f32 %v130_v18 }
 0x122   :  { %v346_v20 = vpop.eup %345 }
 0x123   :  { %v132_v21 = vmul.f32 0.5, %v346_v20 }
 0x125   :  { %v133_v22 = vadd.f32 0.5, %v132_v21 }
 0x127   :  { %v134_v23 = vpack.c.bf16 %v133_v22, %v133_v22 }
 0x129   :  { %324 = vmatmul.mubr.bf16.vlgmr.msra.gmra.mrb[0].mxu1 %v134_v23 }
 0x1fc   :  { %v240_v25 = vpop.f32.mrb[0].mxu1 }
 0x1fd   :  { %v241_v26 = vadd.f32 %v278_v24, %v240_v25  ;;  %v325_v27 = vpop.f32.mrb[1].mxu1 }
 0x1fe   :  { %v243_v28 = vpop.f32.mrb[2].mxu1 }
 0x1ff   :  { %246 = vmax.xlane.f32.xlu0 %v241_v26  ;;  %v326_v29 = vpop.f32.mrb[3].mxu1 }
 0x28c   :  { %v247_v30 = vpop.xlane.xlu0 %246 }
 0x28d   :  { %v248_v31 = vsub.f32 %v241_v26, %v247_v30 }
 0x28f   :  { %v249_v32 = vmul.f32 1.442695, %v248_v31 }
 0x291   :  { %347 = vpow2.f32 %v249_v32 }
 0x29b   :  { %v348_v33 = vpop.eup %347 }
 0x29c   :  { %251 = vadd.xlane.f32.xlu0 %v348_v33 }
 0x329   :  { %v252_v34 = vpop.xlane.xlu0 %251 }
 0x32a   :  { %349 = vlog2.f32 %v252_v34 }
 0x334   :  { %v350_v35 = vpop.eup %349 }
 0x335   :  { %v254_v36 = vmul.f32 0.6931472, %v350_v35 }
 0x337   :  { %v255_v37 = vsub.f32 %v248_v31, %v254_v36 }
 0x339   :  { %257 = vst.msk [vmem:[#allocation8] sm:$0xff] %vm256_vm2, %v255_v37 }
 0x33a   :  { %428 = shalt.err (!%p425_p0)
}
 0x33b   :  { %s429_s10 = scalar_lea.hbm %s548_s5, 128 }
 0x33c   :  { %p430_p1 = scmp.ne.s32.totalorder %s548_s5, %s429_s10  ;;  %p433_p2 = scmp.lt.u32.totalorder %s429_s10, %s548_s5 }
 0x33e   :  { %p435_p3 = pnand %p433_p2, %p430_p1 }
 0x340   :  { %438 = shalt.err (!%p435_p3)
}
 0x341   :  { %267 = dma.vmem_to_hbm [thread:$0]  %s265_s7, 128, %s548_s5, [#allocation4]  }
 0x342   :  { %443 = dma.done.wait [#allocation4], 128  }
 0x343   :  { %444 = vsyncadd [#allocation4], 4294967168 }
 0x344   :  { %271 = vsyncpa [#allocation3], 1 }
 0x345   :  { %272 = vsyncpa [#allocation6], 1 }
 0x346   :  { %273 = vsyncpa [#allocation4], 1 }

</bundles_post_ra>
